<compile_context>
chip_gen: v5e
topology: v5e:2x2
jax: 0.10.0
libtpu: 0.0.40
codegen_flags: <defaults>
</compile_context>

<pallas_src>
import functools

import jax
import jax.numpy as jnp
from jax.experimental import pallas as pl
from jax.experimental.pallas import tpu as pltpu


def _resblock_kernel(w1_ref, w2_ref, x_ref, out_ref, pad_ref, *,
                     H, W, C, KH, KW, P, batch_block):
    """Fused depthwise ResBlock body for one grid step (batch_block images).

    w1_ref, w2_ref : VMEM [KH*KW, W*C]   per-tap rows, pre-tiled along W
                     (w_ref[dh*KW+dw, w*C+c] == torch_weight[c, 0, dh, dw])
    x_ref, out_ref : VMEM [batch_block, H, W*C]   channels-last, (W,C) fused on lanes
    pad_ref        : VMEM scratch [H+2P, (W+2P)*C]   zero border, reused per image
    """
    WC = W * C
    WCp = (W + 2 * P) * C
    cdt = pad_ref.dtype

    # Zero only the 2P-wide border strips; the center is fully overwritten for
    # every image below and the border never becomes non-zero.  Must be per-step
    # (NOT a program_id()==0 one-time init) so it is safe under megacore sharding.
    if P > 0:
        pad_ref[0:P, :] = jnp.zeros((P, WCp), cdt)
        pad_ref[P + H:, :] = jnp.zeros((P, WCp), cdt)
        pad_ref[P:P + H, 0:P * C] = jnp.zeros((H, P * C), cdt)
        pad_ref[P:P + H, (P + W) * C:] = jnp.zeros((H, P * C), cdt)

    def depthwise(w_ref):
        # One lane-aligned row load per dh; the KW lane shifts are static slices
        # of that register value (no extra misaligned VMEM loads per tap).
        acc = jnp.zeros((H, WC), jnp.float32)
        for dh in range(KH):
            row = pad_ref[dh:dh + H, :]                       # [H, (W+2P)*C]
            for dw in range(KW):
                tap = w_ref[dh * KW + dw:dh * KW + dw + 1, :]  # [1, W*C] lane vector
                acc = acc + row[:, dw * C:dw * C + WC] * tap
        return acc

    for g in range(batch_block):
        # conv1: place x in the scratch center, shifted multiply-accumulate.
        pad_ref[P:P + H, P * C:P * C + WC] = x_ref[g].astype(cdt)
        t = jnp.maximum(depthwise(w1_ref), 0.0)               # ReLU(conv1(x))

        # conv2: border of the scratch is still zero; only rewrite the center.
        # TODO(synk): keep `t` in registers (pltpu.roll for the lane shifts)
        # instead of this round trip once planes are large enough to matter.
        pad_ref[P:P + H, P * C:P * C + WC] = t.astype(cdt)
        acc = depthwise(w2_ref)

        # Residual add + ReLU; re-read x_ref here (still resident in the input
        # block) instead of keeping an f32 copy of x live across both convs.
        out = jnp.maximum(acc + x_ref[g].astype(jnp.float32), 0.0)
        out_ref[g] = out.astype(out_ref.dtype)


def _pick_batch_block(batch, bytes_per_image, target_bytes=512 * 1024):
    """Largest divisor of `batch` keeping the per-step payload near the target,
    preferring an even grid extent so both v7x TensorCores get work."""
    want = max(1, target_bytes // max(bytes_per_image, 1))
    divisors = [d for d in range(1, batch + 1) if batch % d == 0]
    fit = [d for d in divisors if d <= want] or [1]
    even_grid = [d for d in fit if (batch // d) % 2 == 0]
    return max(even_grid) if even_grid else max(fit)


def resblock_forward(x, w1, w2, *, kernel_size, stride, padding):
    """x: [B, C, H, W]. w1, w2: [C, KH, KW] depthwise taps (PyTorch [C,1,KH,KW] squeezed).

    Returns relu(conv2(relu(conv1(x))) + x) with depthwise (groups=C), bias-free convs.
    """
    B, C, H, W = x.shape
    KH = KW = kernel_size
    # Residual add only type-checks for "same"-shaped convs; even K would read OOB.
    assert kernel_size % 2 == 1, "kernel_size must be odd"
    assert stride == 1, "residual add requires stride == 1"
    assert padding == (kernel_size - 1) // 2, "residual add requires 'same' padding"
    P = padding
    KK = KH * KW
    WC = W * C
    WCp = (W + 2 * P) * C

    # bf16 fast path on v6e/v7x (scratch + tap multiplies in bf16, f32 accumulate);
    # f32 inputs keep the all-f32 path.
    # TODO(synk): force f32 compute on v5e (no bf16 VALU) via pltpu.get_tpu_info().
    cdt = jnp.bfloat16 if x.dtype == jnp.bfloat16 else jnp.float32

    # Per-tap weight rows, tiled along W so each tap is a dense [W*C] lane vector:
    # w_tiled[dh*KW+dw, w*C+c] == w[c, dh, dw].
    def tile_taps(w):
        wt = jnp.transpose(jnp.asarray(w, cdt), (1, 2, 0)).reshape(KK, 1, C)
        return jnp.broadcast_to(wt, (KK, W, C)).reshape(KK, WC)

    w1t = tile_taps(w1)
    w2t = tile_taps(w2)

    # Lane-dense channels-last view: fuse (W, C) onto the lane axis.  This is
    # wrapper-side layout plumbing; the kernel still reads x once / writes once.
    x2 = jnp.transpose(x, (0, 2, 3, 1)).reshape(B, H, WC)

    itemsize = jnp.dtype(x.dtype).itemsize
    bb = _pick_batch_block(B, C * H * W * itemsize)
    num_steps = B // bb

    kernel = functools.partial(_resblock_kernel, H=H, W=W, C=C,
                               KH=KH, KW=KW, P=P, batch_block=bb)

    # Per-step VMEM footprint: double-buffered in/out blocks + scratch + taps.
    block_bytes = bb * H * WC * itemsize
    scratch_bytes = (H + 2 * P) * WCp * jnp.dtype(cdt).itemsize
    taps_bytes = 2 * KK * WC * jnp.dtype(cdt).itemsize
    footprint = 4 * block_bytes + scratch_bytes + taps_bytes
    vmem_limit = int(min(max(4 * footprint, 16 << 20), 48 << 20))
    # TODO(synk): tile H with a 2P-row halo once the footprint approaches v7x's
    # 64 MiB physical VMEM (very large planes); not needed for this module's sizes.

    flops = 4 * B * C * H * W * KK + 3 * B * C * H * W      # 2 convs (MACs) + add + relus
    bytes_accessed = (2 * B * C * H * W * itemsize
                      + 2 * KK * WC * jnp.dtype(cdt).itemsize)

    y2 = pl.pallas_call(
        kernel,
        out_shape=jax.ShapeDtypeStruct((B, H, WC), x.dtype),
        grid_spec=pltpu.PrefetchScalarGridSpec(
            num_scalar_prefetch=0,
            grid=(num_steps,),
            in_specs=[
                pl.BlockSpec((KK, WC), lambda i: (0, 0)),        # w1 taps (resident)
                pl.BlockSpec((KK, WC), lambda i: (0, 0)),        # w2 taps (resident)
                pl.BlockSpec((bb, H, WC), lambda i: (i, 0, 0)),  # x block
            ],
            out_specs=pl.BlockSpec((bb, H, WC), lambda i: (i, 0, 0)),
            scratch_shapes=[pltpu.VMEM((H + 2 * P, WCp), cdt)],
        ),
        compiler_params=pltpu.CompilerParams(
            dimension_semantics=("parallel",),
            vmem_limit_bytes=vmem_limit),
        cost_estimate=pl.CostEstimate(
            flops=flops, transcendentals=0, bytes_accessed=bytes_accessed),
    )(w1t, w2t, x2)

    # Back to the module's NCHW contract.
    return jnp.transpose(y2.reshape(B, H, W, C), (0, 3, 1, 2))


if __name__ == "__main__":
    # Small shapes consistent with the module: ResBlock(c_in=4, c_out=4, k=3, stride=1, pad=1).
    B, C, H, W = 2, 4, 16, 16
    kernel_size, stride, padding = 3, 1, 1

    key = jax.random.PRNGKey(0)
    kx, k1, k2 = jax.random.split(key, 3)
    x = jax.random.normal(kx, (B, C, H, W), dtype=jnp.float32)
    w1 = jax.random.normal(k1, (C, kernel_size, kernel_size), dtype=jnp.float32) * 0.3
    w2 = jax.random.normal(k2, (C, kernel_size, kernel_size), dtype=jnp.float32) * 0.3

    y = resblock_forward(x, w1, w2, kernel_size=kernel_size, stride=stride,
                         padding=padding)
    y = jax.block_until_ready(y)

    # Plain-JAX/XLA reference (same conv convention as nn.Conv2d groups=C, bias=False).
    def dw_conv(v, w):
        return jax.lax.conv_general_dilated(
            v, w.reshape(C, 1, kernel_size, kernel_size),
            window_strides=(stride, stride),
            padding=((padding, padding), (padding, padding)),
            dimension_numbers=("NCHW", "OIHW", "NCHW"),
            feature_group_count=C)

    t_ref = jnp.maximum(dw_conv(x, w1), 0.0)
    y_ref = jnp.maximum(dw_conv(t_ref, w2) + x, 0.0)

    assert y.shape == (B, C, H, W)
    assert jnp.allclose(y, y_ref, atol=1e-4, rtol=1e-4), float(jnp.max(jnp.abs(y - y_ref)))
    print("KERNEL_OK")
</pallas_src>

<mosaic_0001>
module attributes {stable_mosaic.version = 11 : i64} {
  func.func @_resblock_kernel(%arg0: i32, %arg1: memref<9x64xf32, #tpu.memory_space<vmem>>, %arg2: memref<9x64xf32, #tpu.memory_space<vmem>>, %arg3: memref<1x16x64xf32, #tpu.memory_space<vmem>>, %arg4: memref<1x16x64xf32, #tpu.memory_space<vmem>>, %arg5: memref<18x72xf32, #tpu.memory_space<vmem>>) attributes {dimension_semantics = [#tpu.dimension_semantics<parallel>], iteration_bounds = array<i64: 2>, scalar_prefetch = 0 : i64, scratch_operands = 1 : i64, tpu.core_type = #tpu.core_type<tc>, window_params = [{pipeline_mode = #tpu.pipeline_mode<synchronous>, transform_indices = @transform_0, window_bounds = array<i64: 9, 64>}, {pipeline_mode = #tpu.pipeline_mode<synchronous>, transform_indices = @transform_1, window_bounds = array<i64: 9, 64>}, {transform_indices = @transform_2, window_bounds = array<i64: 1, 16, 64>}, {transform_indices = @transform_3, window_bounds = array<i64: 1, 16, 64>}]} {
    %cst = arith.constant 0.000000e+00 : f32
    %0 = vector.broadcast %cst : f32 to vector<1x72xf32>
    %c0 = arith.constant 0 : index
    %c0_0 = arith.constant 0 : index
    %1 = vector.load %arg5[%c0, %c0_0] : memref<18x72xf32, #tpu.memory_space<vmem>>, vector<1x72xf32>
    tpu.vector_store %arg5[%c0, %c0_0], %0 {strides = array<i32>} : memref<18x72xf32, #tpu.memory_space<vmem>>, vector<1x72xf32>,
    %cst_1 = arith.constant 0.000000e+00 : f32
    %2 = vector.broadcast %cst_1 : f32 to vector<1x72xf32>
    %c17 = arith.constant 17 : index
    %c0_2 = arith.constant 0 : index
    %3 = vector.load %arg5[%c17, %c0_2] : memref<18x72xf32, #tpu.memory_space<vmem>>, vector<1x72xf32>
    tpu.vector_store %arg5[%c17, %c0_2], %2 {strides = array<i32>} : memref<18x72xf32, #tpu.memory_space<vmem>>, vector<1x72xf32>,
    %cst_3 = arith.constant 0.000000e+00 : f32
    %4 = vector.broadcast %cst_3 : f32 to vector<16x4xf32>
    %c1 = arith.constant 1 : index
    %c0_4 = arith.constant 0 : index
    %5 = vector.load %arg5[%c1, %c0_4] : memref<18x72xf32, #tpu.memory_space<vmem>>, vector<16x4xf32>
    tpu.vector_store %arg5[%c1, %c0_4], %4 {strides = array<i32>} : memref<18x72xf32, #tpu.memory_space<vmem>>, vector<16x4xf32>,
    %cst_5 = arith.constant 0.000000e+00 : f32
    %6 = vector.broadcast %cst_5 : f32 to vector<16x4xf32>
    %c1_6 = arith.constant 1 : index
    %c68 = arith.constant 68 : index
    %7 = vector.load %arg5[%c1_6, %c68] : memref<18x72xf32, #tpu.memory_space<vmem>>, vector<16x4xf32>
    tpu.vector_store %arg5[%c1_6, %c68], %6 {strides = array<i32>} : memref<18x72xf32, #tpu.memory_space<vmem>>, vector<16x4xf32>,
    %c0_7 = arith.constant 0 : index
    %c0_8 = arith.constant 0 : index
    %c0_9 = arith.constant 0 : index
    %8 = vector.load %arg3[%c0_7, %c0_8, %c0_9] : memref<1x16x64xf32, #tpu.memory_space<vmem>>, vector<1x16x64xf32>
    %9 = vector.shape_cast %8 : vector<1x16x64xf32> to vector<16x64xf32>
    %c1_10 = arith.constant 1 : index
    %c4 = arith.constant 4 : index
    %10 = vector.load %arg5[%c1_10, %c4] : memref<18x72xf32, #tpu.memory_space<vmem>>, vector<16x64xf32>
    tpu.vector_store %arg5[%c1_10, %c4], %9 {strides = array<i32>} : memref<18x72xf32, #tpu.memory_space<vmem>>, vector<16x64xf32>,
    %cst_11 = arith.constant 0.000000e+00 : f32
    %11 = vector.broadcast %cst_11 : f32 to vector<16x64xf32>
    %c0_12 = arith.constant 0 : index
    %c0_13 = arith.constant 0 : index
    %12 = vector.load %arg5[%c0_12, %c0_13] : memref<18x72xf32, #tpu.memory_space<vmem>>, vector<16x72xf32>
    %c0_14 = arith.constant 0 : index
    %c0_15 = arith.constant 0 : index
    %13 = vector.load %arg1[%c0_14, %c0_15] : memref<9x64xf32, #tpu.memory_space<vmem>>, vector<1x64xf32>
    %14 = vector.extract_strided_slice %12 {offsets = [0, 0], sizes = [16, 64], strides = [1, 1]} : vector<16x72xf32> to vector<16x64xf32>
    %15 = vector.broadcast %13 : vector<1x64xf32> to vector<16x64xf32>
    %16 = arith.mulf %14, %15 : vector<16x64xf32>
    %17 = arith.addf %11, %16 : vector<16x64xf32>
    %c1_16 = arith.constant 1 : index
    %c0_17 = arith.constant 0 : index
    %18 = vector.load %arg1[%c1_16, %c0_17] : memref<9x64xf32, #tpu.memory_space<vmem>>, vector<1x64xf32>
    %19 = vector.extract_strided_slice %12 {offsets = [0, 4], sizes = [16, 64], strides = [1, 1]} : vector<16x72xf32> to vector<16x64xf32>
    %20 = vector.broadcast %18 : vector<1x64xf32> to vector<16x64xf32>
    %21 = arith.mulf %19, %20 : vector<16x64xf32>
    %22 = arith.addf %17, %21 : vector<16x64xf32>
    %c2 = arith.constant 2 : index
    %c0_18 = arith.constant 0 : index
    %23 = vector.load %arg1[%c2, %c0_18] : memref<9x64xf32, #tpu.memory_space<vmem>>, vector<1x64xf32>
    %24 = vector.extract_strided_slice %12 {offsets = [0, 8], sizes = [16, 64], strides = [1, 1]} : vector<16x72xf32> to vector<16x64xf32>
    %25 = vector.broadcast %23 : vector<1x64xf32> to vector<16x64xf32>
    %26 = arith.mulf %24, %25 : vector<16x64xf32>
    %27 = arith.addf %22, %26 : vector<16x64xf32>
    %c1_19 = arith.constant 1 : index
    %c0_20 = arith.constant 0 : index
    %28 = vector.load %arg5[%c1_19, %c0_20] : memref<18x72xf32, #tpu.memory_space<vmem>>, vector<16x72xf32>
    %c3 = arith.constant 3 : index
    %c0_21 = arith.constant 0 : index
    %29 = vector.load %arg1[%c3, %c0_21] : memref<9x64xf32, #tpu.memory_space<vmem>>, vector<1x64xf32>
    %30 = vector.extract_strided_slice %28 {offsets = [0, 0], sizes = [16, 64], strides = [1, 1]} : vector<16x72xf32> to vector<16x64xf32>
    %31 = vector.broadcast %29 : vector<1x64xf32> to vector<16x64xf32>
    %32 = arith.mulf %30, %31 : vector<16x64xf32>
    %33 = arith.addf %27, %32 : vector<16x64xf32>
    %c4_22 = arith.constant 4 : index
    %c0_23 = arith.constant 0 : index
    %34 = vector.load %arg1[%c4_22, %c0_23] : memref<9x64xf32, #tpu.memory_space<vmem>>, vector<1x64xf32>
    %35 = vector.extract_strided_slice %28 {offsets = [0, 4], sizes = [16, 64], strides = [1, 1]} : vector<16x72xf32> to vector<16x64xf32>
    %36 = vector.broadcast %34 : vector<1x64xf32> to vector<16x64xf32>
    %37 = arith.mulf %35, %36 : vector<16x64xf32>
    %38 = arith.addf %33, %37 : vector<16x64xf32>
    %c5 = arith.constant 5 : index
    %c0_24 = arith.constant 0 : index
    %39 = vector.load %arg1[%c5, %c0_24] : memref<9x64xf32, #tpu.memory_space<vmem>>, vector<1x64xf32>
    %40 = vector.extract_strided_slice %28 {offsets = [0, 8], sizes = [16, 64], strides = [1, 1]} : vector<16x72xf32> to vector<16x64xf32>
    %41 = vector.broadcast %39 : vector<1x64xf32> to vector<16x64xf32>
    %42 = arith.mulf %40, %41 : vector<16x64xf32>
    %43 = arith.addf %38, %42 : vector<16x64xf32>
    %c2_25 = arith.constant 2 : index
    %c0_26 = arith.constant 0 : index
    %44 = vector.load %arg5[%c2_25, %c0_26] : memref<18x72xf32, #tpu.memory_space<vmem>>, vector<16x72xf32>
    %c6 = arith.constant 6 : index
    %c0_27 = arith.constant 0 : index
    %45 = vector.load %arg1[%c6, %c0_27] : memref<9x64xf32, #tpu.memory_space<vmem>>, vector<1x64xf32>
    %46 = vector.extract_strided_slice %44 {offsets = [0, 0], sizes = [16, 64], strides = [1, 1]} : vector<16x72xf32> to vector<16x64xf32>
    %47 = vector.broadcast %45 : vector<1x64xf32> to vector<16x64xf32>
    %48 = arith.mulf %46, %47 : vector<16x64xf32>
    %49 = arith.addf %43, %48 : vector<16x64xf32>
    %c7 = arith.constant 7 : index
    %c0_28 = arith.constant 0 : index
    %50 = vector.load %arg1[%c7, %c0_28] : memref<9x64xf32, #tpu.memory_space<vmem>>, vector<1x64xf32>
    %51 = vector.extract_strided_slice %44 {offsets = [0, 4], sizes = [16, 64], strides = [1, 1]} : vector<16x72xf32> to vector<16x64xf32>
    %52 = vector.broadcast %50 : vector<1x64xf32> to vector<16x64xf32>
    %53 = arith.mulf %51, %52 : vector<16x64xf32>
    %54 = arith.addf %49, %53 : vector<16x64xf32>
    %c8 = arith.constant 8 : index
    %c0_29 = arith.constant 0 : index
    %55 = vector.load %arg1[%c8, %c0_29] : memref<9x64xf32, #tpu.memory_space<vmem>>, vector<1x64xf32>
    %56 = vector.extract_strided_slice %44 {offsets = [0, 8], sizes = [16, 64], strides = [1, 1]} : vector<16x72xf32> to vector<16x64xf32>
    %57 = vector.broadcast %55 : vector<1x64xf32> to vector<16x64xf32>
    %58 = arith.mulf %56, %57 : vector<16x64xf32>
    %59 = arith.addf %54, %58 : vector<16x64xf32>
    %cst_30 = arith.constant 0.000000e+00 : f32
    %60 = vector.broadcast %cst_30 : f32 to vector<16x64xf32>
    %61 = arith.maximumf %59, %60 : vector<16x64xf32>
    %c1_31 = arith.constant 1 : index
    %c4_32 = arith.constant 4 : index
    %62 = vector.load %arg5[%c1_31, %c4_32] : memref<18x72xf32, #tpu.memory_space<vmem>>, vector<16x64xf32>
    tpu.vector_store %arg5[%c1_31, %c4_32], %61 {strides = array<i32>} : memref<18x72xf32, #tpu.memory_space<vmem>>, vector<16x64xf32>,
    %cst_33 = arith.constant 0.000000e+00 : f32
    %63 = vector.broadcast %cst_33 : f32 to vector<16x64xf32>
    %c0_34 = arith.constant 0 : index
    %c0_35 = arith.constant 0 : index
    %64 = vector.load %arg5[%c0_34, %c0_35] : memref<18x72xf32, #tpu.memory_space<vmem>>, vector<16x72xf32>
    %c0_36 = arith.constant 0 : index
    %c0_37 = arith.constant 0 : index
    %65 = vector.load %arg2[%c0_36, %c0_37] : memref<9x64xf32, #tpu.memory_space<vmem>>, vector<1x64xf32>
    %66 = vector.extract_strided_slice %64 {offsets = [0, 0], sizes = [16, 64], strides = [1, 1]} : vector<16x72xf32> to vector<16x64xf32>
    %67 = vector.broadcast %65 : vector<1x64xf32> to vector<16x64xf32>
    %68 = arith.mulf %66, %67 : vector<16x64xf32>
    %69 = arith.addf %63, %68 : vector<16x64xf32>
    %c1_38 = arith.constant 1 : index
    %c0_39 = arith.constant 0 : index
    %70 = vector.load %arg2[%c1_38, %c0_39] : memref<9x64xf32, #tpu.memory_space<vmem>>, vector<1x64xf32>
    %71 = vector.extract_strided_slice %64 {offsets = [0, 4], sizes = [16, 64], strides = [1, 1]} : vector<16x72xf32> to vector<16x64xf32>
    %72 = vector.broadcast %70 : vector<1x64xf32> to vector<16x64xf32>
    %73 = arith.mulf %71, %72 : vector<16x64xf32>
    %74 = arith.addf %69, %73 : vector<16x64xf32>
    %c2_40 = arith.constant 2 : index
    %c0_41 = arith.constant 0 : index
    %75 = vector.load %arg2[%c2_40, %c0_41] : memref<9x64xf32, #tpu.memory_space<vmem>>, vector<1x64xf32>
    %76 = vector.extract_strided_slice %64 {offsets = [0, 8], sizes = [16, 64], strides = [1, 1]} : vector<16x72xf32> to vector<16x64xf32>
    %77 = vector.broadcast %75 : vector<1x64xf32> to vector<16x64xf32>
    %78 = arith.mulf %76, %77 : vector<16x64xf32>
    %79 = arith.addf %74, %78 : vector<16x64xf32>
    %c1_42 = arith.constant 1 : index
    %c0_43 = arith.constant 0 : index
    %80 = vector.load %arg5[%c1_42, %c0_43] : memref<18x72xf32, #tpu.memory_space<vmem>>, vector<16x72xf32>
    %c3_44 = arith.constant 3 : index
    %c0_45 = arith.constant 0 : index
    %81 = vector.load %arg2[%c3_44, %c0_45] : memref<9x64xf32, #tpu.memory_space<vmem>>, vector<1x64xf32>
    %82 = vector.extract_strided_slice %80 {offsets = [0, 0], sizes = [16, 64], strides = [1, 1]} : vector<16x72xf32> to vector<16x64xf32>
    %83 = vector.broadcast %81 : vector<1x64xf32> to vector<16x64xf32>
    %84 = arith.mulf %82, %83 : vector<16x64xf32>
    %85 = arith.addf %79, %84 : vector<16x64xf32>
    %c4_46 = arith.constant 4 : index
    %c0_47 = arith.constant 0 : index
    %86 = vector.load %arg2[%c4_46, %c0_47] : memref<9x64xf32, #tpu.memory_space<vmem>>, vector<1x64xf32>
    %87 = vector.extract_strided_slice %80 {offsets = [0, 4], sizes = [16, 64], strides = [1, 1]} : vector<16x72xf32> to vector<16x64xf32>
    %88 = vector.broadcast %86 : vector<1x64xf32> to vector<16x64xf32>
    %89 = arith.mulf %87, %88 : vector<16x64xf32>
    %90 = arith.addf %85, %89 : vector<16x64xf32>
    %c5_48 = arith.constant 5 : index
    %c0_49 = arith.constant 0 : index
    %91 = vector.load %arg2[%c5_48, %c0_49] : memref<9x64xf32, #tpu.memory_space<vmem>>, vector<1x64xf32>
    %92 = vector.extract_strided_slice %80 {offsets = [0, 8], sizes = [16, 64], strides = [1, 1]} : vector<16x72xf32> to vector<16x64xf32>
    %93 = vector.broadcast %91 : vector<1x64xf32> to vector<16x64xf32>
    %94 = arith.mulf %92, %93 : vector<16x64xf32>
    %95 = arith.addf %90, %94 : vector<16x64xf32>
    %c2_50 = arith.constant 2 : index
    %c0_51 = arith.constant 0 : index
    %96 = vector.load %arg5[%c2_50, %c0_51] : memref<18x72xf32, #tpu.memory_space<vmem>>, vector<16x72xf32>
    %c6_52 = arith.constant 6 : index
    %c0_53 = arith.constant 0 : index
    %97 = vector.load %arg2[%c6_52, %c0_53] : memref<9x64xf32, #tpu.memory_space<vmem>>, vector<1x64xf32>
    %98 = vector.extract_strided_slice %96 {offsets = [0, 0], sizes = [16, 64], strides = [1, 1]} : vector<16x72xf32> to vector<16x64xf32>
    %99 = vector.broadcast %97 : vector<1x64xf32> to vector<16x64xf32>
    %100 = arith.mulf %98, %99 : vector<16x64xf32>
    %101 = arith.addf %95, %100 : vector<16x64xf32>
    %c7_54 = arith.constant 7 : index
    %c0_55 = arith.constant 0 : index
    %102 = vector.load %arg2[%c7_54, %c0_55] : memref<9x64xf32, #tpu.memory_space<vmem>>, vector<1x64xf32>
    %103 = vector.extract_strided_slice %96 {offsets = [0, 4], sizes = [16, 64], strides = [1, 1]} : vector<16x72xf32> to vector<16x64xf32>
    %104 = vector.broadcast %102 : vector<1x64xf32> to vector<16x64xf32>
    %105 = arith.mulf %103, %104 : vector<16x64xf32>
    %106 = arith.addf %101, %105 : vector<16x64xf32>
    %c8_56 = arith.constant 8 : index
    %c0_57 = arith.constant 0 : index
    %107 = vector.load %arg2[%c8_56, %c0_57] : memref<9x64xf32, #tpu.memory_space<vmem>>, vector<1x64xf32>
    %108 = vector.extract_strided_slice %96 {offsets = [0, 8], sizes = [16, 64], strides = [1, 1]} : vector<16x72xf32> to vector<16x64xf32>
    %109 = vector.broadcast %107 : vector<1x64xf32> to vector<16x64xf32>
    %110 = arith.mulf %108, %109 : vector<16x64xf32>
    %111 = arith.addf %106, %110 : vector<16x64xf32>
    %c0_58 = arith.constant 0 : index
    %c0_59 = arith.constant 0 : index
    %c0_60 = arith.constant 0 : index
    %112 = vector.load %arg3[%c0_58, %c0_59, %c0_60] : memref<1x16x64xf32, #tpu.memory_space<vmem>>, vector<1x16x64xf32>
    %113 = vector.shape_cast %112 : vector<1x16x64xf32> to vector<16x64xf32>
    %114 = arith.addf %111, %113 : vector<16x64xf32>
    %cst_61 = arith.constant 0.000000e+00 : f32
    %115 = vector.broadcast %cst_61 : f32 to vector<16x64xf32>
    %116 = arith.maximumf %114, %115 : vector<16x64xf32>
    %c0_62 = arith.constant 0 : index
    %c0_63 = arith.constant 0 : index
    %c0_64 = arith.constant 0 : index
    %117 = vector.load %arg4[%c0_62, %c0_63, %c0_64] : memref<1x16x64xf32, #tpu.memory_space<vmem>>, vector<1x16x64xf32>
    %118 = vector.shape_cast %117 : vector<1x16x64xf32> to vector<16x64xf32>
    %119 = vector.shape_cast %116 : vector<16x64xf32> to vector<1x16x64xf32>
    tpu.vector_store %arg4[%c0_62, %c0_63, %c0_64], %119 {strides = array<i32>} : memref<1x16x64xf32, #tpu.memory_space<vmem>>, vector<1x16x64xf32>,
    return
  }
  func.func @transform_0(%arg0: i32) -> (i32, i32) {
    %c0_i32 = arith.constant 0 : i32
    %c0_i32_0 = arith.constant 0 : i32
    %c0_i32_1 = arith.constant 0 : i32
    return %c0_i32, %c0_i32_0 : i32, i32
  }
  func.func @transform_1(%arg0: i32) -> (i32, i32) {
    %c0_i32 = arith.constant 0 : i32
    %c0_i32_0 = arith.constant 0 : i32
    %c0_i32_1 = arith.constant 0 : i32
    return %c0_i32, %c0_i32_0 : i32, i32
  }
  func.func @transform_2(%arg0: i32) -> (i32, i32, i32) {
    %c0_i32 = arith.constant 0 : i32
    %c0_i32_0 = arith.constant 0 : i32
    %c0_i32_1 = arith.constant 0 : i32
    return %arg0, %c0_i32, %c0_i32_0 : i32, i32, i32
  }
  func.func @transform_3(%arg0: i32) -> (i32, i32, i32) {
    %c0_i32 = arith.constant 0 : i32
    %c0_i32_0 = arith.constant 0 : i32
    %c0_i32_1 = arith.constant 0 : i32
    return %arg0, %c0_i32, %c0_i32_0 : i32, i32, i32
  }
}

</mosaic_0001>

<bundles_post_ra>
// kernel: tpu_custom_call.1
= control target key start
LH: loop header
LB: loop body
LE: loop exit
PB: predicated region body
PF: predicated region fallthrough
CT: control target
= control target key end

     0   :  { %8 = vsyncpa [#allocation4], 0  ;;  %s1158_s0 = inlined_call_operand.hbm [shape: f32[9,64], index: 0, kind: input, shape index: {}]   ;;  %s1159_s1 = inlined_call_operand.hbm [shape: f32[9,64], index: 1, kind: input, shape index: {}]   ;;  %s1160_s2 = inlined_call_operand.hbm [shape: f32[2,16,64], index: 2, kind: input, shape index: {}]   ;;  %s1161_s3 = inlined_call_operand.hbm [shape: f32[2,16,64], index: 3, kind: output, shape index: {}]  }
   0x1   :  { %9 = vsyncpa [#allocation7], 0 }
   0x2   :  { %10 = vsyncpa [#allocation5], 0 }
   0x3   :  { %12 = vsyncpa [#allocation5 + $0x1], 0  ;;  %s946_s12 = smov 0   ;;  %s948_s13 = smov 0  }
   0x4   :  { %s950_s14 = smov 0   ;;  %s952_s15 = smov 0  }
   0x5 LB: > { %s967_s16 = sadd.s32 4294967295, %s914_s15   ;;  %s637_s17 = sadd.s32 4294967294, %s914_s15   ;;  %s914_s15 = sphi %s952_s15, %s1171_s15   ;;  %s910_s14 = sphi %s950_s14, %s1170_s14   ;;  %s906_s13 = sphi %s948_s13, %s1169_s13   ;;  %s902_s12 = sphi %s946_s12, %s1168_s12  }
   0x6   : > { %p80_p0 = scmp.ne.s32.totalorder %s906_s13, %s902_s12  ;;  %p81_p1 = scmp.eq.s32.totalorder %s967_s16, 0 }
   0x7   : > { %p104_p2 = scmp.eq.s32.totalorder %s967_s16, 1  ;;  %p110_p3 = scmp.eq.s32.totalorder %s637_s17, 1 }
   0x8   : > { %p976_p4 = por %p81_p1, %p80_p0  ;;  %p638_p5 = scmp.ge.s32.totalorder %s914_s15, 1 }
   0x9   : > { %p981_p6 = por %p110_p3, %p80_p0  ;;  %p117_p7 = scmp.lt.s32.totalorder %s914_s15, 3 }
   0xa   : > { %s128_s22 = sshll.u32 %s1158_s0, 4  ;;  %s916_s24 = smov [#allocation3]   ;;  %s129_s22 = int_to_ptr.hbm [resolvable:$true] %s128_s22 }
   0xb   : > { %p989_p8 = pnand %p638_p5, %p117_p7  ;;  %s130_s25 = sshll.u32 %s916_s24, 4  ;;  %s131_s25 = int_to_ptr.vmem [resolvable:$true] %s130_s25 }
   0xc   : > { %s142_s28 = sshll.u32 %s1159_s1, 4  ;;  %s917_s29 = smov 128   ;;  %s143_s28 = int_to_ptr.hbm [resolvable:$true] %s142_s28 }
   0xd   : > { %p669_p9 = pneg %p989_p8  ;;  %s918_s30 = smov 8  }
   0xe   : > { %s919_s4 = smov [#allocation6]   ;;  %s1008_s6 = sadd.s32 1, %s914_s15  }
   0xf   : > { %p670_p10 = pnand %p669_p9, %p81_p1  ;;  %s144_s5 = sshll.u32 %s919_s4, 4  ;;  %s145_s5 = int_to_ptr.vmem [resolvable:$true] %s144_s5 }
  0x10   : > { %s67_s7 = sadd.s32 1, %s910_s14  ;;  %s64_s8 = ssub.s32 %s914_s15, %s1008_s6 }
  0x11   : > { %672 = dma.hbm_to_vmem [thread:$0]  (!%p670_p10), %s129_s22, 256, %s131_s25, [#allocation4], %s917_s29, %s917_s29, %s918_s30  }
  0x12   : > { %675 = dma.hbm_to_vmem [thread:$0]  (!%p670_p10), %s143_s28, 256, %s145_s5, [#allocation7], %s917_s29, %s917_s29, %s918_s30  }
  0x13   : > { %p74_p12 = scmp.ne.s32.totalorder %s910_s14, %s906_s13  ;;  %p65_p13 = scmp.eq.s32.totalorder %s64_s8, 0 }
  0x14   : > { %p75_p0 = scmp.eq.s32.totalorder %s914_s15, 0  ;;  %p686_p7 = scmp.lt.s32.totalorder %s914_s15, 2 }
  0x15   : > { %p1018_p3 = por %p104_p2, %p74_p12  ;;  %s158_s11 = sand.u32 1, %s914_s15  }
  0x16   : > { %s1023_s10 = scalar_select %p65_p13, %s910_s14, %s67_s7  }
  0x17   : > { %p76_p5 = por %p75_p0, %p74_p12  ;;  %s160_s17 = sand.u32 1, %s910_s14  }
  0x18   : > { %s642_s20 = sshll.u32 %s160_s17, 4  ;;  %s655_s21 = sshll.u32 %s914_s15, 4 }
  0x19   : > { %s167_s25 = scalar_lea.hbm %s1160_s2, %s655_s21  ;;  %s162_s27 = scalar_lea.vmem [#allocation8], %s642_s20 }
  0x1a   : > { %s168_s26 = sshll.u32 %s167_s25, 4  ;;  %s170_s28 = sshll.u32 %s162_s27, 4  ;;  %s169_s26 = int_to_ptr.hbm [resolvable:$true] %s168_s26  ;;  %s171_s28 = int_to_ptr.vmem [resolvable:$true] %s170_s28 }
  0x1b   : > { %p1032_p2 = pnand %p686_p7, %p76_p5  ;;  %s159_s5 = scalar_lea.sflag [#allocation4], %s158_s11 }
  0x1c   : > { %s810_s7 = sshra.s32 %s169_s26, 4  ;;  %s817_s20 = scalar_lea.hbm %s1160_s2, 32  ;;  %s811_s7 = int_to_ptr.hbm [resolvable:$true] %s810_s7 }
  0x1d   : > { %s812_s8 = scalar_lea.hbm %s811_s7, 16  ;;  %p814_p10 = pneg %p1032_p2 }
  0x1e   : > { %p813_p9 = scmp.ne.s32.totalorder %s811_s7, %s812_s8  ;;  %p818_p0 = scmp.lt.s32.totalorder %s811_s7, %s1160_s2 }
  0x1f   : > { %p819_p5 = scmp.lt.s32.totalorder %s817_s20, %s812_s8 }
  0x20   : > { %p815_p12 = pnand %p814_p10, %p813_p9 }
  0x21   : > { %p820_p7 = por %p819_p5, %p818_p0 }
  0x22   : > { %p816_p13 = pneg %p815_p12 }
  0x24   : > { %p821_p11 = pnand %p820_p7, %p816_p13 }
  0x26   : > { %824 = shalt.err (!%p821_p11)
}
  0x27   : > { %679 = dma.hbm_to_vmem [thread:$0]  (!%p1032_p2), %s169_s26, 256, %s171_s28, %s159_s5, %s917_s29, %s917_s29, %s918_s30  }
  0x28   : > { %182 = sbr.rel (%p989_p8) target bundleno = 596 (0x254), region = 32 }
  0x2d   : > { %885 = dma.done.wait (%p81_p1), [#allocation4], 256  }
  0x2e   : > { %887 = vsyncadd (%p81_p1), [#allocation4], 4294967040 }
  0x2f   : > { %889 = dma.done.wait (%p81_p1), [#allocation7], 256  }
  0x30   : > { %891 = vsyncadd (%p81_p1), [#allocation7], 4294967040  ;;  %s194_s29 = sand.u32 1, %s967_s16   ;;  %s196_s30 = sand.u32 1, %s906_s13  }
  0x31   : > { %s1063_s23 = sshll.u32 %s196_s30, 4  ;;  %s195_s11 = scalar_lea.sflag [#allocation4], %s194_s29 }
  0x32   : > { %s198_s25 = scalar_lea.vmem [#allocation8], %s1063_s23 }
  0x33   : > { %893 = dma.done.wait (%p976_p4), %s195_s11, 256  }
  0x34   : > { %895 = vsyncadd (%p976_p4), %s195_s11, 4294967040  ;;  %v1070_v0 = vld [vmem:[%s198_s25] sm:$0xff]  ;;  %s920_s26 = smov 4   ;;  %v1075_v3 = vld [vmem:[%s198_s25 + $0x8] sm:$0xff]  ;;  %s921_s18 = smov 8   ;;  %vm222_vm0 = vcmask 581632  }
  0x35   : > { %v732_v1 = vld [vmem:[#allocation3 + $0x1] ss:$0 sm:$0xff]  ;;  %235 = vrot.lane.b32.xlu0 %v1070_v0, %s920_s26  ;;  %v736_v2 = vld [vmem:[#allocation3 + $0x4] ss:$0 sm:$0xff]  ;;  %v733_v4 = vld [vmem:[#allocation3 + $0x2] ss:$0 sm:$0xff] }
  0x36   : > { %255 = vrot.lane.b32.xlu1 %v732_v1, %s920_s26  ;;  %299 = vrot.lane.b32.xlu2 %v736_v2, %s920_s26  ;;  %v737_v5 = vld [vmem:[#allocation3 + $0x5] ss:$0 sm:$0xff]  ;;  %v734_v6 = vld [vmem:[#allocation3 + $0x7] ss:$0 sm:$0xff]  ;;  %v735_v7 = vld [vmem:[#allocation3 + $0x8] ss:$0 sm:$0xff] }
  0x37   : > { %vm225_vm1 = vcmask 31744   ;;  %vm228_vm2 = vcmask 589344   ;;  %v922_v8 = vmov 0.0   ;;  %vm241_vm3 = vcmask 556064   ;;  %s923_s27 = smov 124   ;;  %s924_s28 = smov 120  }
  0x38   : > { %223 = vst.msk [vmem:[#allocation2] sm:$0x1] %vm222_vm0, %v922_v8  ;;  %v740_v35 = vld [vmem:[#allocation6 + $0x1] ss:$0 sm:$0xff]  ;;  %v742_v36 = vld [vmem:[#allocation6 + $0x5] ss:$0 sm:$0xff] }
  0x39   : > { %224 = vst.msk [vmem:[#allocation2 + $0x11] sm:$0x1] %vm222_vm0, %v922_v8  ;;  %v738_v39 = vld [vmem:[#allocation3] ss:$0 sm:$0xff]  ;;  %v739_v47 = vld [vmem:[#allocation3 + $0x3] ss:$0 sm:$0xff] }
  0x3a   : > { %226 = vst.msk [vmem:[#allocation2 + $0x1] sm:$0xff] %vm225_vm1, %v922_v8  ;;  %v741_v58 = vld [vmem:[#allocation3 + $0x6] ss:$0 sm:$0xff]  ;;  %s656_s4 = sshll.u32 %s967_s16, 4  ;;  %vm526_vm4 = vcmask 523264   ;;  %s221_s17 = scalar_lea.vmem [#allocation9], %s1063_s23 }
  0x3b   : > { %229 = vst.msk [vmem:[#allocation2 + $0x1] sm:$0xff] %vm228_vm2, %v922_v8  ;;  %s541_s8 = scalar_lea.hbm %s1161_s3, %s656_s4  ;;  %s542_s21 = sshll.u32 %s221_s17, 4  ;;  %s543_s21 = int_to_ptr.vmem [resolvable:$true] %s542_s21 }
  0x3c   : > { %227 = vst.msk [vmem:[#allocation2 + $0x9] sm:$0xff] %vm225_vm1, %v922_v8  ;;  %s544_s20 = sshll.u32 %s541_s8, 4  ;;  %s530_s16 = scalar_lea.sflag [#allocation5], %s196_s30  ;;  %s545_s20 = int_to_ptr.hbm [resolvable:$true] %s544_s20 }
  0x3d   : > { %237 = vrot.lane.b32.xlu0 %v1075_v3, %s920_s26  ;;  %230 = vst.msk [vmem:[#allocation2 + $0x9] sm:$0xff] %vm228_vm2, %v922_v8  ;;  %s854_s22 = sshra.s32 %s545_s20, 4  ;;  %s860_s11 = scalar_lea.hbm %s1161_s3, 32  ;;  %s855_s22 = int_to_ptr.hbm [resolvable:$true] %s854_s22 }
  0x3e   : > { %273 = vrot.lane.b32.xlu1 %v733_v4, %s921_s18  ;;  %317 = vrot.lane.b32.xlu2 %v737_v5, %s921_s18  ;;  %s856_s24 = scalar_lea.hbm %s855_s22, 16  ;;  %p861_p11 = scmp.lt.s32.totalorder %s855_s22, %s1161_s3 }
  0x3f   : > { %p857_p1 = scmp.ne.s32.totalorder %s855_s22, %s856_s24  ;;  %p862_p2 = scmp.lt.s32.totalorder %s860_s11, %s856_s24 }
  0x41   : > { %p858_p4 = pnand %p857_p1, %p1018_p3  ;;  %p863_p9 = por %p862_p2, %p861_p11 }
  0x43   : > { %p859_p8 = pneg %p858_p4 }
  0x45   : > { %343 = vrot.lane.b32.xlu0 %v734_v6, %s920_s26  ;;  %p864_p10 = pnand %p863_p9, %p859_p8 }
  0x46   : > { %361 = vrot.lane.b32.xlu1 %v735_v7, %s921_s18 }
  0x90   : > { %v300_v16 = vpop.permute.xlu2 %299 }
  0x98   : > { %v318_v22 = vpop.permute.xlu2 %317 }
  0xa7   : > { %v236_v9 = vpop.permute.xlu0 %235 }
  0xa8   : > { %242 = vst.msk [vmem:[#allocation2 + $0x1] sm:$0xff] %vm241_vm3, %v236_v9  ;;  %v256_v10 = vpop.permute.xlu1 %255 }
  0xaf   : > { %v244_v11 = vld [vmem:[#allocation2] sm:$0xff]  ;;  %v238_v12 = vpop.permute.xlu0 %237 }
  0xb0   : > { %v258_v13 = vmul.f32 %v256_v10, %v244_v11  ;;  %243 = vst.msk [vmem:[#allocation2 + $0x9] sm:$0xff] %vm241_vm3, %v238_v12  ;;  %v274_v14 = vpop.permute.xlu1 %273  ;;  %v288_v23 = vld [vmem:[#allocation2 + $0x1] sm:$0xff]  ;;  %v248_v42 = vmul.f32 %v738_v39, %v244_v11 }
  0xb1   : > { %v276_v15 = vmul.f32 %v274_v14, %v244_v11  ;;  %v320_v26 = vmul.f32 %v318_v22, %v288_v23  ;;  %v302_v27 = vmul.f32 %v300_v16, %v288_v23  ;;  %v292_v50 = vmul.f32 %v739_v47, %v288_v23 }
  0xb2   : > { %262 = vrot.lane.b32.xlu2 %v258_v13, %s923_s27 }
  0xb3   : > { %280 = vrot.lane.b32.xlu1 %v276_v15, %s924_s28  ;;  %v744_v15 = vld [vmem:[#allocation6 + $0x2] ss:$0 sm:$0xff] }
  0xb7   : > { %v245_v17 = vld [vmem:[#allocation2 + $0x8] sm:$0xff]  ;;  %v344_v24 = vpop.permute.xlu0 %343 }
  0xb8   : > { %v277_v18 = vmul.f32 %v274_v14, %v245_v17  ;;  %v259_v19 = vmul.f32 %v256_v10, %v245_v17  ;;  %v289_v20 = vld [vmem:[#allocation2 + $0x9] sm:$0xff]  ;;  %v362_v30 = vpop.permute.xlu1 %361  ;;  %v249_v43 = vmul.f32 %v738_v39, %v245_v17 }
  0xb9   : > { %v303_v21 = vmul.f32 %v300_v16, %v289_v20  ;;  %v332_v25 = vld [vmem:[#allocation2 + $0x2] sm:$0xff]  ;;  %v333_v29 = vld [vmem:[#allocation2 + $0xa] sm:$0xff]  ;;  %v321_v32 = vmul.f32 %v318_v22, %v289_v20  ;;  %v293_v52 = vmul.f32 %v739_v47, %v289_v20 }
  0xba   : > { %264 = vrot.lane.b32.xlu0 %v259_v19, %s923_s27  ;;  %282 = vrot.lane.b32.xlu2 %v277_v18, %s924_s28  ;;  %v346_v28 = vmul.f32 %v344_v24, %v332_v25  ;;  %v347_v31 = vmul.f32 %v344_v24, %v333_v29  ;;  %v365_v33 = vmul.f32 %v362_v30, %v333_v29  ;;  %v743_v14 = vld [vmem:[#allocation6 + $0x4] ss:$0 sm:$0xff]  ;;  %v745_v16 = vld [vmem:[#allocation6 + $0x8] ss:$0 sm:$0xff]  ;;  %v746_v17 = vld [vmem:[#allocation6 + $0x7] ss:$0 sm:$0xff] }
  0xbb   : > { %308 = vrot.lane.b32.xlu1 %v303_v21, %s923_s27  ;;  %v364_v34 = vmul.f32 %v362_v30, %v332_v25  ;;  %v336_v62 = vmul.f32 %v741_v58, %v332_v25  ;;  %v337_v1 = vmul.f32 %v741_v58, %v333_v29 }
  0xc2   : > { %306 = vrot.lane.b32.xlu0 %v302_v27, %s923_s27  ;;  %324 = vrot.lane.b32.xlu2 %v320_v26, %s924_s28 }
  0xc3   : > { %350 = vrot.lane.b32.xlu1 %v346_v28, %s923_s27 }
  0xca   : > { %326 = vrot.lane.b32.xlu0 %v321_v32, %s924_s28  ;;  %352 = vrot.lane.b32.xlu2 %v347_v31, %s923_s27 }
  0xcb   : > { %370 = vrot.lane.b32.xlu1 %v365_v33, %s924_s28 }
  0xd2   : > { %368 = vrot.lane.b32.xlu0 %v364_v34, %s924_s28 }
  0xd3   : > { %399 = vrot.lane.b32.xlu1 %v740_v35, %s920_s26 }
  0xdb   : > { %461 = vrot.lane.b32.xlu1 %v742_v36, %s921_s18 }
 0x10c   : > { %v263_v37 = vpop.permute.xlu2 %262 }
 0x10d   : > { %v268_v45 = vadd.f32 %v263_v37, %v248_v42 }
 0x114   : > { %v283_v40 = vpop.permute.xlu2 %282 }
 0x11c   : > { %v325_v54 = vpop.permute.xlu2 %324 }
 0x124   : > { %v353_v5 = vpop.permute.xlu2 %352 }
 0x125   : > { %v281_v38 = vpop.permute.xlu1 %280 }
 0x126   : > { %v286_v48 = vadd.f32 %v281_v38, %v268_v45 }
 0x128   : > { %v294_v53 = vadd.f32 %v292_v50, %v286_v48 }
 0x12c   : > { %v265_v41 = vpop.permute.xlu0 %264 }
 0x12d   : > { %v309_v44 = vpop.permute.xlu1 %308  ;;  %v269_v46 = vadd.f32 %v265_v41, %v249_v43 }
 0x12f   : > { %v287_v49 = vadd.f32 %v283_v40, %v269_v46  ;;  %v748_v46 = vld [vmem:[#allocation6 + $0x3] ss:$0 sm:$0xff] }
 0x131   : > { %v295_v55 = vadd.f32 %v293_v52, %v287_v49 }
 0x133   : > { %v313_v59 = vadd.f32 %v309_v44, %v295_v55  ;;  %v747_v44 = vld [vmem:[#allocation6] ss:$0 sm:$0xff] }
 0x134   : > { %v307_v51 = vpop.permute.xlu0 %306 }
 0x135   : > { %v312_v56 = vadd.f32 %v307_v51, %v294_v53  ;;  %v351_v57 = vpop.permute.xlu1 %350 }
 0x137   : > { %v330_v60 = vadd.f32 %v325_v54, %v312_v56 }
 0x139   : > { %v338_v2 = vadd.f32 %v336_v62, %v330_v60  ;;  %v749_v62 = vld [vmem:[#allocation6 + $0x6] ss:$0 sm:$0xff] }
 0x13b   : > { %v356_v8 = vadd.f32 %v351_v57, %v338_v2 }
 0x13c   : > { %v327_v61 = vpop.permute.xlu0 %326 }
 0x13d   : > { %v331_v63 = vadd.f32 %v327_v61, %v313_v59  ;;  %v371_v7 = vpop.permute.xlu1 %370 }
 0x13f   : > { %v339_v4 = vadd.f32 %v337_v1, %v331_v63 }
 0x141   : > { %v357_v6 = vadd.f32 %v353_v5, %v339_v4 }
 0x143   : > { %v375_v9 = vadd.f32 %v371_v7, %v357_v6 }
 0x144   : > { %v369_v10 = vpop.permute.xlu0 %368 }
 0x145   : > { %v377_v11 = vmax.f32 %v375_v9, 0.0  ;;  %v374_v12 = vadd.f32 %v369_v10, %v356_v8  ;;  %v400_v19 = vpop.permute.xlu1 %399 }
 0x147   : > { %v376_v13 = vmax.f32 %v374_v12, 0.0  ;;  %382 = vrot.lane.b32.xlu0 %v377_v11, %s920_s26 }
 0x149   : > { %380 = vrot.lane.b32.xlu2 %v376_v13, %s920_s26 }
 0x14d   : > { %v462_v33 = vpop.permute.xlu1 %461 }
 0x14f   : > { %443 = vrot.lane.b32.xlu0 %v743_v14, %s920_s26 }
 0x151   : > { %417 = vrot.lane.b32.xlu2 %v744_v15, %s921_s18 }
 0x157   : > { %505 = vrot.lane.b32.xlu0 %v745_v16, %s921_s18 }
 0x159   : > { %487 = vrot.lane.b32.xlu2 %v746_v17, %s920_s26 }
 0x1a3   : > { %v381_v18 = vpop.permute.xlu2 %380 }
 0x1a4   : > { %386 = vst.msk [vmem:[#allocation2 + $0x1] sm:$0xff] %vm241_vm3, %v381_v18 }
 0x1ab   : > { %v388_v20 = vld [vmem:[#allocation2] sm:$0xff]  ;;  %v418_v21 = vpop.permute.xlu2 %417 }
 0x1ac   : > { %v420_v22 = vmul.f32 %v418_v21, %v388_v20  ;;  %v402_v23 = vmul.f32 %v400_v19, %v388_v20  ;;  %v432_v34 = vld [vmem:[#allocation2 + $0x1] sm:$0xff]  ;;  %v392_v45 = vmul.f32 %v747_v44, %v388_v20 }
 0x1ad   : > { %v464_v36 = vmul.f32 %v462_v33, %v432_v34  ;;  %v436_v51 = vmul.f32 %v748_v46, %v432_v34 }
 0x1ae   : > { %406 = vrot.lane.b32.xlu1 %v402_v23, %s923_s27  ;;  %424 = vrot.lane.b32.xlu0 %v420_v22, %s924_s28 }
 0x1b3   : > { %v488_v32 = vpop.permute.xlu2 %487 }
 0x1b9   : > { %v383_v24 = vpop.permute.xlu0 %382 }
 0x1ba   : > { %387 = vst.msk [vmem:[#allocation2 + $0x9] sm:$0xff] %vm241_vm3, %v383_v24 }
 0x1c1   : > { %v433_v25 = vld [vmem:[#allocation2 + $0x9] sm:$0xff]  ;;  %v444_v26 = vpop.permute.xlu0 %443 }
 0x1c2   : > { %v447_v27 = vmul.f32 %v444_v26, %v433_v25  ;;  %v389_v28 = vld [vmem:[#allocation2 + $0x8] sm:$0xff]  ;;  %v446_v37 = vmul.f32 %v444_v26, %v432_v34  ;;  %v465_v42 = vmul.f32 %v462_v33, %v433_v25  ;;  %v437_v60 = vmul.f32 %v748_v46, %v433_v25 }
 0x1c3   : > { %v403_v29 = vmul.f32 %v400_v19, %v389_v28  ;;  %v421_v30 = vmul.f32 %v418_v21, %v389_v28  ;;  %v476_v31 = vld [vmem:[#allocation2 + $0x2] sm:$0xff]  ;;  %v477_v39 = vld [vmem:[#allocation2 + $0xa] sm:$0xff]  ;;  %v393_v55 = vmul.f32 %v747_v44, %v389_v28 }
 0x1c4   : > { %452 = vrot.lane.b32.xlu0 %v447_v27, %s923_s27  ;;  %v490_v35 = vmul.f32 %v488_v32, %v476_v31  ;;  %v491_v41 = vmul.f32 %v488_v32, %v477_v39  ;;  %v481_v5 = vmul.f32 %v749_v62, %v477_v39  ;;  %v480_v9 = vmul.f32 %v749_v62, %v476_v31 }
 0x1c5   : > { %408 = vrot.lane.b32.xlu2 %v403_v29, %s923_s27  ;;  %426 = vrot.lane.b32.xlu1 %v421_v30, %s924_s28 }
 0x1c9   : > { %v506_v38 = vpop.permute.xlu0 %505 }
 0x1ca   : > { %v509_v40 = vmul.f32 %v506_v38, %v477_v39  ;;  %v508_v43 = vmul.f32 %v506_v38, %v476_v31 }
 0x1cc   : > { %494 = vrot.lane.b32.xlu0 %v490_v35, %s923_s27 }
 0x1cd   : > { %450 = vrot.lane.b32.xlu2 %v446_v37, %s923_s27  ;;  %468 = vrot.lane.b32.xlu1 %v464_v36, %s924_s28 }
 0x1d4   : > { %514 = vrot.lane.b32.xlu0 %v509_v40, %s924_s28 }
 0x1d5   : > { %470 = vrot.lane.b32.xlu2 %v465_v42, %s924_s28  ;;  %496 = vrot.lane.b32.xlu1 %v491_v41, %s923_s27 }
 0x1dd   : > { %512 = vrot.lane.b32.xlu2 %v508_v43, %s924_s28 }
 0x21f   : > { %v409_v53 = vpop.permute.xlu2 %408 }
 0x220   : > { %v407_v47 = vpop.permute.xlu1 %406  ;;  %v425_v49 = vpop.permute.xlu0 %424  ;;  %v413_v56 = vadd.f32 %v409_v53, %v393_v55 }
 0x221   : > { %v412_v48 = vadd.f32 %v407_v47, %v392_v45 }
 0x223   : > { %v430_v50 = vadd.f32 %v425_v49, %v412_v48 }
 0x225   : > { %v438_v52 = vadd.f32 %v436_v51, %v430_v50 }
 0x227   : > { %v451_v54 = vpop.permute.xlu2 %450 }
 0x228   : > { %v456_v2 = vadd.f32 %v451_v54, %v438_v52 }
 0x22f   : > { %v471_v63 = vpop.permute.xlu2 %470 }
 0x236   : > { %v453_v57 = vpop.permute.xlu0 %452 }
 0x237   : > { %v427_v58 = vpop.permute.xlu1 %426  ;;  %v513_v13 = vpop.permute.xlu2 %512 }
 0x238   : > { %v431_v59 = vadd.f32 %v427_v58, %v413_v56 }
 0x23a   : > { %v439_v61 = vadd.f32 %v437_v60, %v431_v59 }
 0x23c   : > { %v457_v1 = vadd.f32 %v453_v57, %v439_v61 }
 0x23e   : > { %v475_v4 = vadd.f32 %v471_v63, %v457_v1  ;;  %v495_v7 = vpop.permute.xlu0 %494 }
 0x23f   : > { %v469_v6 = vpop.permute.xlu1 %468 }
 0x240   : > { %v474_v8 = vadd.f32 %v469_v6, %v456_v2  ;;  %v483_v10 = vadd.f32 %v481_v5, %v475_v4 }
 0x242   : > { %v482_v11 = vadd.f32 %v480_v9, %v474_v8 }
 0x244   : > { %v500_v12 = vadd.f32 %v495_v7, %v482_v11 }
 0x246   : > { %v518_v14 = vadd.f32 %v513_v13, %v500_v12  ;;  %v515_v18 = vpop.permute.xlu0 %514 }
 0x247   : > { %v497_v15 = vpop.permute.xlu1 %496 }
 0x248   : > { %v522_v16 = vadd.f32 %v518_v14, %v1070_v0  ;;  %v501_v17 = vadd.f32 %v497_v15, %v483_v10 }
 0x24a   : > { %v524_v19 = vmax.f32 %v522_v16, 0.0  ;;  %v519_v20 = vadd.f32 %v515_v18, %v501_v17 }
 0x24c   : > { %527 = vst.msk [vmem:[%s221_s17] sm:$0xff] %vm526_vm4, %v524_v19  ;;  %v523_v21 = vadd.f32 %v519_v20, %v1075_v3 }
 0x24e   : > { %v525_v22 = vmax.f32 %v523_v21, 0.0 }
 0x250   : > { %528 = vst.msk [vmem:[%s221_s17 + $0x8] sm:$0xff] %vm526_vm4, %v525_v22 }
 0x251   : > { %867 = shalt.err (!%p864_p10)
}
 0x252   : > { %s925_s30 = smov 128  }
 0x253   : > { %667 = dma.vmem_to_hbm [thread:$0]  (%p1018_p3), %s543_s21, 256, %s545_s20, %s530_s16, %s925_s30, %s925_s30, %s921_s18  }
 0x254 PF: > { %s559_s27 = sand.u32 1, %s902_s12   ;;  %p1167_p12 = scmp.ge.s32.totalorder %s914_s15, 2 }
 0x255   : > { %s560_s28 = scalar_lea.sflag [#allocation5], %s559_s27 }
 0x256   : > { %p681_p13 = pnand %p1167_p12, %p981_p6 }
 0x258   : > { %p682_p0 = pneg %p681_p13 }
 0x25a   : > { %897 = dma.done.wait (%p682_p0), %s560_s28, 256  }
 0x25b   : > { %899 = vsyncadd (%p682_p0), %s560_s28, 4294967040  ;;  %p15_p5 = scmp.ge.s32.totalorder %s1008_s6, 4   ;;  %s1168_s12 = smov %s906_s13 }
 0x25c   : > { %s1169_s13 = smov %s910_s14  ;;  %s1170_s14 = smov %s1023_s10 }
 0x25d   : > { %s1171_s15 = smov %s1008_s6  ;;  %17 = sbr.rel (!%p15_p5) target bundleno = 5 (0x5), region = 84 }
 0x262   :  { %566 = vsyncpa [#allocation4], 1 }
 0x263   :  { %568 = vsyncpa [#allocation4 + $0x1], 1 }
 0x264   :  { %569 = vsyncpa [#allocation7], 1 }
 0x265   :  { %570 = vsyncpa [#allocation5], 1 }
 0x266   :  { %572 = vsyncpa [#allocation5 + $0x1], 1 }

</bundles_post_ra>
